<compile_context>
chip_gen: v5e
topology: v5e:2x2
jax: 0.10.0
libtpu: 0.0.40
codegen_flags: <defaults>
</compile_context>

<pallas_src>
import functools

import jax
import jax.numpy as jnp
from jax.experimental import pallas as pl
from jax.experimental.pallas import tpu as pltpu


def _round_up(x, m):
    return (x + m - 1) // m * m


# ----------------------------------------------------------------------------
# Pallas kernel: one (group, field) step of conv + bias + ReLU + max-pool
# ----------------------------------------------------------------------------
def conv_relu_maxpool_kernel(x_ref, w_ref, b_ref, m_ref, o_ref):
    """im2col-matmul Conv1d + bias + ReLU + mask + max-pool over time.

    x_ref: (1, Mp, Kcp) bf16  im2col rows, flattened (item, time); Mp=NBp*Loutp
    w_ref: (1, Kcp, Fp) bf16  conv weights for this (encoder, field)
    b_ref: (1, 1, Fp)   f32   conv bias (zero at padded filter lanes)
    m_ref: (1, Mp, 1)   f32   row-validity mask (0 for padded item/time rows)
    o_ref: (1, NBp, Fp) f32   per-item max-pooled features (lane-dense)
    """
    Mp = x_ref.shape[1]
    Fp = w_ref.shape[2]
    NBp = o_ref.shape[1]
    Loutp = Mp // NBp

    # Single MXU push: all conv window taps are folded into the contraction
    # (Kcp = round_up(win*E, 128)); f32 accumulation.
    acc = jnp.dot(x_ref[0], w_ref[0], preferred_element_type=jnp.float32)
    # f32 VPU epilogue.  Masking padded rows to 0 is exact: ReLU output >= 0.
    h = jnp.maximum(acc + b_ref[0], 0.0) * m_ref[0]
    # Loutp is a multiple of 8, so this reshape + reduce stays tile-aligned.
    # TODO(synk): for long production sequences, tile Loutp on a grid axis and
    #             keep a running (NBp, Fp) max instead of the full accumulator.
    o_ref[0] = jnp.max(h.reshape(NBp, Loutp, Fp), axis=1)


def conv_relu_maxpool_all(x_all, w_stack, b_stack, mask_all, NBp):
    """One pallas_call covering all 4 (group, field) encoder passes.

    x_all:    (4, Mp, Kcp) bf16   [cand-title, cand-body, clk-title, clk-body]
    w_stack:  (4, Kcp, Fp) bf16   [news-title, news-body, user-title, user-body]
    b_stack:  (4, 1, Fp)   f32
    mask_all: (4, Mp, 1)   f32
    returns:  (4, NBp, Fp) f32 pooled features
    """
    S, Mp, Kcp = x_all.shape
    Fp = w_stack.shape[-1]
    return pl.pallas_call(
        conv_relu_maxpool_kernel,
        out_shape=jax.ShapeDtypeStruct((S, NBp, Fp), jnp.float32),
        grid=(S,),
        in_specs=[
            pl.BlockSpec((1, Mp, Kcp), lambda n: (n, 0, 0)),
            pl.BlockSpec((1, Kcp, Fp), lambda n: (n, 0, 0)),
            pl.BlockSpec((1, 1, Fp), lambda n: (n, 0, 0)),
            pl.BlockSpec((1, Mp, 1), lambda n: (n, 0, 0)),
        ],
        out_specs=pl.BlockSpec((1, NBp, Fp), lambda n: (n, 0, 0)),
        # "parallel": the 4 steps are independent; v7x's two TensorCores can
        # split them (no-op on single-TC v5e/v6e).
        compiler_params=pltpu.CompilerParams(
            dimension_semantics=("parallel",)),
    )(x_all, w_stack, b_stack, mask_all)


# ----------------------------------------------------------------------------
# Parameters
# ----------------------------------------------------------------------------
def init_encoder_params(key, word_emb_dim, num_filters, window_size,
                        category_emb_dim, num_embeddings, num_categories):
    ks = jax.random.split(key, 6)
    scale = 0.1
    return {
        "word_emb": scale * jax.random.normal(
            ks[0], (num_embeddings, word_emb_dim), jnp.float32),
        "cat_emb": scale * jax.random.normal(
            ks[1], (num_categories, category_emb_dim), jnp.float32),
        "title_w": scale * jax.random.normal(
            ks[2], (window_size, word_emb_dim, num_filters), jnp.float32),
        "title_b": scale * jax.random.normal(
            ks[3], (1, num_filters), jnp.float32),
        "body_w": scale * jax.random.normal(
            ks[4], (window_size, word_emb_dim, num_filters), jnp.float32),
        "body_b": scale * jax.random.normal(
            ks[5], (1, num_filters), jnp.float32),
    }


def init_model_params(key, word_emb_dim, num_filters, window_size,
                      category_emb_dim, num_embeddings, num_categories):
    k_news, k_user, k_pred = jax.random.split(key, 3)
    D = 2 * num_filters + category_emb_dim
    return {
        "news_encoder": init_encoder_params(
            k_news, word_emb_dim, num_filters, window_size,
            category_emb_dim, num_embeddings, num_categories),
        "user_encoder": init_encoder_params(
            k_user, word_emb_dim, num_filters, window_size,
            category_emb_dim, num_embeddings, num_categories),
        "pred_w": 0.1 * jax.random.normal(k_pred, (2 * D, 1), jnp.float32),
        "pred_b": jnp.zeros((1, 1), jnp.float32),
    }


# ----------------------------------------------------------------------------
# Wrapper-side data prep (embedding gathers, im2col, padding) + predictor glue
# ----------------------------------------------------------------------------
def _embed_windowed(word_emb, ids, pad, win):
    """Gather padded + im2col'd bf16 embeddings: ids (..., L) -> (..., Lout, win*E).

    Token ids are padded with a dedicated zero-embedding row, so the conv
    zero-padding falls directly out of the gather.
    TODO(synk): for production vocab/sequence sizes, move this gather into the
                kernel via PrefetchScalarGridSpec + manual DMA instead of
                materializing the windowed bf16 tensor in HBM.
    """
    n_emb, E = word_emb.shape
    L = ids.shape[-1]
    Lout = L + 2 * pad - win + 1              # matches PyTorch Conv1d output
    table = jnp.concatenate(
        [word_emb, jnp.zeros((1, E), word_emb.dtype)], axis=0
    ).astype(jnp.bfloat16)
    ids_p = jnp.pad(ids, [(0, 0)] * (ids.ndim - 1) + [(pad, pad)],
                    constant_values=n_emb)
    widx = jnp.arange(Lout)[:, None] + jnp.arange(win)[None, :]   # (Lout, win)
    wids = ids_p[..., widx]                                       # (..., Lout, win)
    x = jnp.take(table, wids, axis=0)                             # (..., Lout, win, E)
    return x.reshape(ids.shape[:-1] + (Lout, win * E))


def _pack_slab(x, NBp, Loutp, Kcp):
    """Pad an (items, Lout, Kc) slab to (NBp*Loutp, Kcp) + its validity mask."""
    n_items, Lout, Kc = x.shape
    xp = jnp.pad(x, ((0, NBp - n_items), (0, Loutp - Lout), (0, Kcp - Kc)))
    m = ((jnp.arange(NBp)[:, None] < n_items)
         & (jnp.arange(Loutp)[None, :] < Lout)).astype(jnp.float32)
    return xp.reshape(NBp * Loutp, Kcp), m.reshape(NBp * Loutp, 1)


@functools.partial(jax.jit, static_argnames=("window_size",))
def news_recommendation_forward(params, title, body, category, clicked_news,
                                window_size):
    news_p = params["news_encoder"]
    user_p = params["user_encoder"]
    E = news_p["word_emb"].shape[1]
    F = news_p["title_w"].shape[-1]
    C = news_p["cat_emb"].shape[-1]
    Fp = _round_up(F, 128)                    # lane-dense kernel output
    win = window_size
    pad = win // 2
    B = title.shape[0]
    K = len(clicked_news)                     # static (pytree length)
    # TODO(synk): K == 0 (empty clicked history) is not handled (mean of empty).

    # ---- stack clicked-news token ids --------------------------------------
    clicked_titles = jnp.stack([c[0] for c in clicked_news], axis=0)  # (K,B,Lt)
    clicked_bodies = jnp.stack([c[1] for c in clicked_news], axis=0)  # (K,B,Lb)
    clicked_cats = jnp.stack([c[2] for c in clicked_news], axis=0)    # (K,B)

    # ---- im2col'd bf16 embeddings per (group, field) -----------------------
    x_ct = _embed_windowed(news_p["word_emb"], title, pad, win)          # (B,Lo,Kc)
    x_cb = _embed_windowed(news_p["word_emb"], body, pad, win)
    x_ut = _embed_windowed(user_p["word_emb"], clicked_titles, pad, win)
    x_ub = _embed_windowed(user_p["word_emb"], clicked_bodies, pad, win)
    x_ut = x_ut.reshape((-1,) + x_ut.shape[-2:])                         # (K*B,Lo,Kc)
    x_ub = x_ub.reshape((-1,) + x_ub.shape[-2:])

    slabs = [x_ct, x_cb, x_ut, x_ub]          # [cand-t, cand-b, clk-t, clk-b]
    Kc = win * E
    # TODO(synk): if win*E or F exceed 256, tile the contraction / output dims
    #             in 256-wide chunks for the v6e/v7x MXU.
    Kcp = _round_up(Kc, 128)                  # aligned contraction
    Loutp = _round_up(max(s.shape[-2] for s in slabs), 8)   # sublane-aligned time
    NBp = _round_up(max(s.shape[0] for s in slabs), 8)      # = round_up(K*B, 8)

    packed = [_pack_slab(s, NBp, Loutp, Kcp) for s in slabs]
    x_all = jnp.stack([p[0] for p in packed], axis=0)       # (4, Mp, Kcp) bf16
    mask_all = jnp.stack([p[1] for p in packed], axis=0)    # (4, Mp, 1)   f32

    # ---- stacked conv weights: [news-title, news-body, user-title, user-body]
    def conv_wb(p, name_w, name_b):
        w = p[name_w].reshape(Kc, F)                                   # (win*E, F)
        w = jnp.pad(w, ((0, Kcp - Kc), (0, Fp - F))).astype(jnp.bfloat16)
        b = jnp.pad(p[name_b], ((0, 0), (0, Fp - F))).astype(jnp.float32)
        return w, b

    wb = [conv_wb(news_p, "title_w", "title_b"),
          conv_wb(news_p, "body_w", "body_b"),
          conv_wb(user_p, "title_w", "title_b"),
          conv_wb(user_p, "body_w", "body_b")]
    w_stack = jnp.stack([w for w, _ in wb], axis=0)          # (4, Kcp, Fp)
    b_stack = jnp.stack([b for _, b in wb], axis=0)          # (4, 1, Fp)

    # ---- single pallas_call for the whole conv-encoder stage ---------------
    pooled = conv_relu_maxpool_all(x_all, w_stack, b_stack, mask_all, NBp)

    cand_title = pooled[0, :B]                               # (B, Fp)
    cand_body = pooled[1, :B]                                # (B, Fp)
    clk_title = pooled[2, :K * B].reshape(K, B, Fp)          # (K, B, Fp)
    clk_body = pooled[3, :K * B].reshape(K, B, Fp)

    # ---- category embeddings (plain gathers, f32) ---------------------------
    cat_cand = jnp.take(news_p["cat_emb"], category, axis=0)        # (B, C)
    cat_clk = jnp.take(user_p["cat_emb"], clicked_cats, axis=0)     # (K, B, C)

    # ---- click predictor: mean over history + linear + sigmoid (plain JAX) --
    # Keep the Fp padding in the features; zero-pad the predictor weight at the
    # padded filter lanes instead (exact: those lanes are exactly 0).
    D = 2 * F + C
    w = params["pred_w"][:, 0]
    b_scalar = params["pred_b"][0, 0]

    def expand_half(wh):   # (D,) -> (2*Fp + C,)
        z = jnp.zeros((Fp - F,), wh.dtype)
        return jnp.concatenate([wh[:F], z, wh[F:2 * F], z, wh[2 * F:]])

    w_cand = expand_half(w[:D])
    w_clk = expand_half(w[D:])

    cand_feat = jnp.concatenate([cand_title, cand_body, cat_cand], axis=-1)
    clk_feat = jnp.concatenate([clk_title, clk_body, cat_clk], axis=-1)
    clicked_mean = jnp.mean(clk_feat, axis=0)                        # (B, 2Fp+C)

    logits = cand_feat @ w_cand + clicked_mean @ w_clk + b_scalar    # (B,)
    return jax.nn.sigmoid(logits)[:, None]                           # (B, 1)


# ----------------------------------------------------------------------------
# Demo
# ----------------------------------------------------------------------------
if __name__ == "__main__":
    B = 2                 # batch
    L_TITLE = 8           # title length
    L_BODY = 8            # body length
    WORD_EMB_DIM = 32
    NUM_FILTERS = 32
    WINDOW_SIZE = 3
    CATEGORY_EMB_DIM = 16
    NUM_EMBEDDINGS = 64
    NUM_CATEGORIES = 8
    K_CLICKED = 3         # number of clicked-news history items

    root = jax.random.PRNGKey(0)
    k_params, k_data = jax.random.split(root)

    params = init_model_params(
        k_params, WORD_EMB_DIM, NUM_FILTERS, WINDOW_SIZE,
        CATEGORY_EMB_DIM, NUM_EMBEDDINGS, NUM_CATEGORIES)

    dks = jax.random.split(k_data, 3 + 3 * K_CLICKED)
    title = jax.random.randint(dks[0], (B, L_TITLE), 0, NUM_EMBEDDINGS,
                               dtype=jnp.int32)
    body = jax.random.randint(dks[1], (B, L_BODY), 0, NUM_EMBEDDINGS,
                              dtype=jnp.int32)
    category = jax.random.randint(dks[2], (B,), 0, NUM_CATEGORIES,
                                  dtype=jnp.int32)
    clicked_news = tuple(
        (jax.random.randint(dks[3 + 3 * i], (B, L_TITLE), 0, NUM_EMBEDDINGS,
                            dtype=jnp.int32),
         jax.random.randint(dks[4 + 3 * i], (B, L_BODY), 0, NUM_EMBEDDINGS,
                            dtype=jnp.int32),
         jax.random.randint(dks[5 + 3 * i], (B,), 0, NUM_CATEGORIES,
                            dtype=jnp.int32))
        for i in range(K_CLICKED)
    )

    click_prob = news_recommendation_forward(
        params, title, body, category, clicked_news, window_size=WINDOW_SIZE)
    click_prob = jax.block_until_ready(click_prob)

    assert click_prob.shape == (B, 1)
    assert bool(jnp.all(jnp.isfinite(click_prob)))
    assert bool(jnp.all((click_prob >= 0.0) & (click_prob <= 1.0)))
    print("KERNEL_OK")
</pallas_src>

<mosaic_0001>
module attributes {stable_mosaic.version = 11 : i64} {
  func.func @conv_relu_maxpool_kernel(%arg0: i32, %arg1: memref<1x64x128xbf16, #tpu.memory_space<vmem>>, %arg2: memref<1x128x128xbf16, #tpu.memory_space<vmem>>, %arg3: memref<1x1x128xf32, #tpu.memory_space<vmem>>, %arg4: memref<1x64x1xf32, #tpu.memory_space<vmem>>, %arg5: memref<1x8x128xf32, #tpu.memory_space<vmem>>) attributes {dimension_semantics = [#tpu.dimension_semantics<parallel>], iteration_bounds = array<i64: 4>, scalar_prefetch = 0 : i64, scratch_operands = 0 : i64, tpu.core_type = #tpu.core_type<tc>, window_params = [{transform_indices = @transform_0, window_bounds = array<i64: 1, 64, 128>}, {transform_indices = @transform_1, window_bounds = array<i64: 1, 128, 128>}, {transform_indices = @transform_2, window_bounds = array<i64: 1, 1, 128>}, {transform_indices = @transform_3, window_bounds = array<i64: 1, 64, 1>}, {transform_indices = @transform_4, window_bounds = array<i64: 1, 8, 128>}]} {
    %c0 = arith.constant 0 : index
    %c0_0 = arith.constant 0 : index
    %c0_1 = arith.constant 0 : index
    %0 = vector.load %arg1[%c0, %c0_0, %c0_1] : memref<1x64x128xbf16, #tpu.memory_space<vmem>>, vector<1x64x128xbf16>
    %1 = vector.shape_cast %0 : vector<1x64x128xbf16> to vector<64x128xbf16>
    %c0_2 = arith.constant 0 : index
    %c0_3 = arith.constant 0 : index
    %c0_4 = arith.constant 0 : index
    %2 = vector.load %arg2[%c0_2, %c0_3, %c0_4] : memref<1x128x128xbf16, #tpu.memory_space<vmem>>, vector<1x128x128xbf16>
    %3 = vector.shape_cast %2 : vector<1x128x128xbf16> to vector<128x128xbf16>
    %cst = arith.constant dense<0.000000e+00> : vector<64x128xf32>
    %4 = tpu.matmul %1, %3, %cst {dimension_numbers = #tpu.dot_dimension_numbers<[1], [0], [0], [1], [0, 0, 1, 1], [], []>} : vector<64x128xbf16>, vector<128x128xbf16>, vector<64x128xf32> -> vector<64x128xf32>
    %c0_5 = arith.constant 0 : index
    %c0_6 = arith.constant 0 : index
    %c0_7 = arith.constant 0 : index
    %5 = vector.load %arg3[%c0_5, %c0_6, %c0_7] : memref<1x1x128xf32, #tpu.memory_space<vmem>>, vector<1x1x128xf32>
    %6 = vector.shape_cast %5 : vector<1x1x128xf32> to vector<1x128xf32>
    %7 = vector.broadcast %6 : vector<1x128xf32> to vector<64x128xf32>
    %8 = arith.addf %4, %7 : vector<64x128xf32>
    %cst_8 = arith.constant 0.000000e+00 : f32
    %9 = vector.broadcast %cst_8 : f32 to vector<64x128xf32>
    %10 = arith.maximumf %8, %9 : vector<64x128xf32>
    %c0_9 = arith.constant 0 : index
    %c0_10 = arith.constant 0 : index
    %c0_11 = arith.constant 0 : index
    %11 = vector.load %arg4[%c0_9, %c0_10, %c0_11] : memref<1x64x1xf32, #tpu.memory_space<vmem>>, vector<1x64x1xf32>
    %12 = vector.shape_cast %11 : vector<1x64x1xf32> to vector<64x1xf32>
    %13 = vector.broadcast %12 : vector<64x1xf32> to vector<64x128xf32>
    %14 = arith.mulf %10, %13 : vector<64x128xf32>
    %15 = vector.shape_cast %14 : vector<64x128xf32> to vector<8x8x128xf32>
    %cst_12 = arith.constant dense<0xFF800000> : vector<8x128xf32>
    %16 = vector.multi_reduction <maximumf>, %15, %cst_12 [1] : vector<8x8x128xf32> to vector<8x128xf32>
    %c0_13 = arith.constant 0 : index
    %c0_14 = arith.constant 0 : index
    %c0_15 = arith.constant 0 : index
    %17 = vector.load %arg5[%c0_13, %c0_14, %c0_15] : memref<1x8x128xf32, #tpu.memory_space<vmem>>, vector<1x8x128xf32>
    %18 = vector.shape_cast %17 : vector<1x8x128xf32> to vector<8x128xf32>
    %19 = vector.shape_cast %16 : vector<8x128xf32> to vector<1x8x128xf32>
    tpu.vector_store %arg5[%c0_13, %c0_14, %c0_15], %19 {strides = array<i32>} : memref<1x8x128xf32, #tpu.memory_space<vmem>>, vector<1x8x128xf32>,
    return
  }
  func.func @transform_0(%arg0: i32) -> (i32, i32, i32) {
    %c0_i32 = arith.constant 0 : i32
    %c0_i32_0 = arith.constant 0 : i32
    %c0_i32_1 = arith.constant 0 : i32
    return %arg0, %c0_i32, %c0_i32_0 : i32, i32, i32
  }
  func.func @transform_1(%arg0: i32) -> (i32, i32, i32) {
    %c0_i32 = arith.constant 0 : i32
    %c0_i32_0 = arith.constant 0 : i32
    %c0_i32_1 = arith.constant 0 : i32
    return %arg0, %c0_i32, %c0_i32_0 : i32, i32, i32
  }
  func.func @transform_2(%arg0: i32) -> (i32, i32, i32) {
    %c0_i32 = arith.constant 0 : i32
    %c0_i32_0 = arith.constant 0 : i32
    %c0_i32_1 = arith.constant 0 : i32
    return %arg0, %c0_i32, %c0_i32_0 : i32, i32, i32
  }
  func.func @transform_3(%arg0: i32) -> (i32, i32, i32) {
    %c0_i32 = arith.constant 0 : i32
    %c0_i32_0 = arith.constant 0 : i32
    %c0_i32_1 = arith.constant 0 : i32
    return %arg0, %c0_i32, %c0_i32_0 : i32, i32, i32
  }
  func.func @transform_4(%arg0: i32) -> (i32, i32, i32) {
    %c0_i32 = arith.constant 0 : i32
    %c0_i32_0 = arith.constant 0 : i32
    %c0_i32_1 = arith.constant 0 : i32
    return %arg0, %c0_i32, %c0_i32_0 : i32, i32, i32
  }
}

</mosaic_0001>

<bundles_post_ra>
// kernel: squeeze.9
= control target key start
LH: loop header
LB: loop body
LE: loop exit
PB: predicated region body
PF: predicated region fallthrough
CT: control target
= control target key end

     0   :  { %s50_s0 = inlined_call_operand.vmem [shape: f32[1,6,128], index: 0, kind: input, shape index: {}]   ;;  %s51_s1 = inlined_call_operand.vmem [shape: f32[3,2,128], index: 1, kind: output, shape index: {}]  }
   0x1   :  { %v2_v0 = vld [vmem:[%s50_s0] sm:$0x3f]  }
   0x2   :  { %3 = vst [vmem:[#allocation0] sm:$0x3] %v2_v0  }
   0x3   :  { %5 = vst [vmem:[#allocation0 + $0x6] sm:$0xc] %v2_v0  }
   0x4   :  { %7 = vst [vmem:[#allocation0 + $0xc] sm:$0x30] %v2_v0  }
   0x9   :  { %v10_v1 = vld [vmem:[#allocation0] sm:$0x3] }
   0xa   :  { %13 = vst [vmem:[%s51_s1] sm:$0x3] %v10_v1  ;;  %v15_v2 = vld [vmem:[#allocation0 + $0x8] sm:$0x3] }
   0xb   :  { %26 = vst [vmem:[%s51_s1 + $0x2] sm:$0x3] %v15_v2  ;;  %v21_v3 = vld [vmem:[#allocation0 + $0x10] sm:$0x3] }
   0xc   :  { %27 = vst [vmem:[%s51_s1 + $0x4] sm:$0x3] %v21_v3 }

// kernel: news_recommendation_forward.1
= control target key start
LH: loop header
LB: loop body
LE: loop exit
PB: predicated region body
PF: predicated region fallthrough
CT: control target
= control target key end

     0   :  { %s749_s15 = smov 0   ;;  %s806_s0 = inlined_call_operand.vmem [shape: bf16[4,64,128], index: 0, kind: input, shape index: {}]   ;;  %s807_s1 = inlined_call_operand.vmem [shape: bf16[4,128,128], index: 1, kind: input, shape index: {}]   ;;  %s808_s2 = inlined_call_operand.vmem [shape: f32[4,1,128], index: 2, kind: input, shape index: {}]   ;;  %s809_s3 = inlined_call_operand.vmem [shape: f32[4,64,1], index: 3, kind: input, shape index: {}]   ;;  %s810_s4 = inlined_call_operand.vmem [shape: f32[4,8,128], index: 4, kind: output, shape index: {}]  }
   0x1 LB: > { %s601_s16 = sadd.s32 4294967295, %s721_s15   ;;  %p605_p0 = scmp.ge.s32.totalorder %s721_s15, 1  ;;  %s721_s15 = sphi %s749_s15, %s14_s15  }
   0x2   : > { %p190_p1 = scmp.lt.s32.totalorder %s721_s15, 5 }
   0x4   : > { %p191_p2 = pnand %p605_p0, %p190_p1 }
   0x5   : > { %p228_p3 = scmp.lt.s32.totalorder (!%p191_p2), %s601_s16, 3 }
   0x6   : > { %194 = sbr.rel (%p191_p2) target bundleno = 209 (0xd1), region = 36 }
   0xb   : > { %s812_s16 = smov (!%p228_p3, %s601_s16), 3  ;;  %v723_v0 = vmov 0   ;;  %vm499_vm0 = vcmask 1041409   ;;  %vm501_vm1 = vcmask 1042434   ;;  %vm503_vm2 = vcmask 1043459  }
   0xc   : > { %711 = vset.pattern.permute.xlu0 %v723_v0  ;;  %712 = vset.pattern.permute.xlu1 %v723_v0  ;;  %s664_s17 = sshll.u32 %s812_s16, 6  ;;  %s240_s26 = scalar_lea.vmem %s808_s2, %s812_s16  ;;  %vm505_vm3 = vcmask 1044484   ;;  %vm507_vm4 = vcmask 1045509   ;;  %vm509_vm5 = vcmask 1046534   ;;  %vm511_vm6 = vcmask 1047559  }
   0xd   : > { %713 = vset.pattern.permute.xlu2 %v723_v0  ;;  %s763_s20 = scalar_lea.vmem %s807_s1, %s664_s17  ;;  %s768_s23 = scalar_lea.vmem %s809_s3, %s664_s17  ;;  %v714_v22 = vld [vmem:[%s240_s26] ss:$0 sm:$0xff] }
   0xe   : > { %v677_v1 = vld [vmem:[%s763_s20 + $0x38] sm:$0xff]  ;;  %v676_v2 = vld [vmem:[%s763_s20 + $0x30] sm:$0xff]  ;;  %v387_v3 = vld [vmem:[%s768_s23] sm:$0xff]  ;;  %s663_s27 = sshll.u32 %s812_s16, 5  ;;  %s612_s7 = sshll.u32 %s812_s16, 3 }
   0xf   : > { %350 = vmatpush.bf16.msra.mxu0 %v677_v1  ;;  %678 = vmatpush.bf16.msra.mxu1 %v677_v1  ;;  %v389_v4 = vld [vmem:[%s768_s23 + $0x10] sm:$0xff]  ;;  %v675_v5 = vld [vmem:[%s763_s20 + $0x28] sm:$0xff]  ;;  %v391_v6 = vld [vmem:[%s768_s23 + $0x20] sm:$0xff]  ;;  %s232_s30 = scalar_lea.vmem %s806_s0, %s663_s27  ;;  %s249_s10 = scalar_lea.vmem %s810_s4, %s612_s7 }
  0x10   : > { %679 = vmatpush.bf16.msra.mxu2 %v677_v1  ;;  %680 = vmatpush.bf16.msra.mxu3 %v677_v1  ;;  %v388_v7 = vld [vmem:[%s768_s23 + $0x8] sm:$0xff]  ;;  %v390_v8 = vld [vmem:[%s768_s23 + $0x18] sm:$0xff]  ;;  %v674_v9 = vld [vmem:[%s763_s20 + $0x20] sm:$0xff] }
  0x11   : > { %397 = vperm.xlu0 %711, %v387_v3   ;;  %407 = vperm.xlu1 %712, %v389_v4   ;;  %v392_v10 = vld [vmem:[%s768_s23 + $0x28] sm:$0xff]  ;;  %v673_v11 = vld [vmem:[%s763_s20 + $0x18] sm:$0xff]  ;;  %v393_v12 = vld [vmem:[%s768_s23 + $0x30] sm:$0xff] }
  0x12   : > { %417 = vperm.xlu2 %713, %v391_v6   ;;  %v394_v13 = vld [vmem:[%s768_s23 + $0x38] sm:$0xff]  ;;  %v672_v14 = vld [vmem:[%s763_s20 + $0x10] sm:$0xff]  ;;  %v671_v15 = vld [vmem:[%s763_s20 + $0x8] sm:$0xff] }
  0x13   : > { %351 = vmatpush.bf16.msra.mxu0 %v676_v2  ;;  %681 = vmatpush.bf16.msra.mxu1 %v676_v2  ;;  %v670_v16 = vld [vmem:[%s763_s20] sm:$0xff]  ;;  %v667_v18 = vld [vmem:[%s232_s30 + $0x8] sm:$0xff]  ;;  %v668_v19 = vld [vmem:[%s232_s30 + $0x10] sm:$0xff] }
  0x14   : > { %682 = vmatpush.bf16.msra.mxu2 %v676_v2  ;;  %683 = vmatpush.bf16.msra.mxu3 %v676_v2  ;;  %v666_v17 = vld [vmem:[%s232_s30] sm:$0xff]  ;;  %v669_v20 = vld [vmem:[%s232_s30 + $0x18] sm:$0xff] }
  0x17   : > { %352 = vmatpush.bf16.msra.mxu0 %v675_v5  ;;  %684 = vmatpush.bf16.msra.mxu1 %v675_v5 }
  0x18   : > { %685 = vmatpush.bf16.msra.mxu2 %v675_v5  ;;  %686 = vmatpush.bf16.msra.mxu3 %v675_v5 }
  0x19   : > { %402 = vperm.xlu0 %711, %v388_v7   ;;  %412 = vperm.xlu1 %712, %v390_v8  }
  0x1a   : > { %422 = vperm.xlu2 %713, %v392_v10  }
  0x1b   : > { %353 = vmatpush.bf16.msra.mxu0 %v674_v9  ;;  %687 = vmatpush.bf16.msra.mxu1 %v674_v9 }
  0x1c   : > { %688 = vmatpush.bf16.msra.mxu2 %v674_v9  ;;  %689 = vmatpush.bf16.msra.mxu3 %v674_v9 }
  0x1f   : > { %354 = vmatpush.bf16.msra.mxu0 %v673_v11  ;;  %690 = vmatpush.bf16.msra.mxu1 %v673_v11 }
  0x20   : > { %691 = vmatpush.bf16.msra.mxu2 %v673_v11  ;;  %692 = vmatpush.bf16.msra.mxu3 %v673_v11 }
  0x21   : > { %427 = vperm.xlu0 %711, %v393_v12   ;;  %432 = vperm.xlu1 %712, %v394_v13  }
  0x23   : > { %355 = vmatpush.bf16.msra.mxu0 %v672_v14  ;;  %693 = vmatpush.bf16.msra.mxu1 %v672_v14 }
  0x24   : > { %694 = vmatpush.bf16.msra.mxu2 %v672_v14  ;;  %695 = vmatpush.bf16.msra.mxu3 %v672_v14 }
  0x27   : > { %356 = vmatpush.bf16.msra.mxu0 %v671_v15  ;;  %696 = vmatpush.bf16.msra.mxu1 %v671_v15 }
  0x28   : > { %697 = vmatpush.bf16.msra.mxu2 %v671_v15  ;;  %698 = vmatpush.bf16.msra.mxu3 %v671_v15 }
  0x2b   : > { %357 = vmatpush.bf16.msra.mxu0 %v670_v16  ;;  %699 = vmatpush.bf16.msra.mxu1 %v670_v16 }
  0x2c   : > { %700 = vmatpush.bf16.msra.mxu2 %v670_v16  ;;  %701 = vmatpush.bf16.msra.mxu3 %v670_v16 }
  0x2e   : > { %358 = vmatmul.bf16.vlgmr.msra.gmra.mxu0 %v666_v17  ;;  %363 = vmatmul.bf16.vlgmr.msra.gmra.mxu1 %v667_v18 }
  0x2f   : > { %368 = vmatmul.bf16.vlgmr.msra.gmra.mxu2 %v668_v19  ;;  %373 = vmatmul.bf16.vlgmr.msra.gmra.mxu3 %v669_v20 }
  0x6c   : > { %v418_v43 = vpop.permute.xlu2 %417 }
  0x74   : > { %v423_v14 = vpop.permute.xlu2 %422 }
  0x83   : > { %v398_v21 = vpop.permute.xlu0 %397  ;;  %v408_v23 = vpop.permute.xlu1 %407 }
  0x8b   : > { %v403_v26 = vpop.permute.xlu0 %402  ;;  %v413_v41 = vpop.permute.xlu1 %412 }
  0x93   : > { %v428_v49 = vpop.permute.xlu0 %427  ;;  %v433_v10 = vpop.permute.xlu1 %432 }
  0xab   : > { %v359_v24 = vpop.f32.mrf.mxu0  ;;  %v364_v25 = vpop.f32.mrf.mxu1 }
  0xac   : > { %v360_v27 = vadd.f32 %v714_v22, %v359_v24  ;;  %v365_v28 = vadd.f32 %v714_v22, %v364_v25 }
  0xae   : > { %v379_v29 = vmax.f32 %v360_v27, 0.0  ;;  %v381_v30 = vmax.f32 %v365_v28, 0.0 }
  0xb0   : > { %v435_v31 = vmul.f32 %v398_v21, %v379_v29  ;;  %v437_v32 = vmul.f32 %v408_v23, %v381_v30 }
  0xb2   : > { %v443_v33 = vrot.slane %v435_v31, 4  ;;  %v455_v34 = vrot.slane %v437_v32, 4  ;;  %v369_v35 = vpop.f32.mrf.mxu2  ;;  %v374_v36 = vpop.f32.mrf.mxu3 }
  0xb3   : > { %v370_v37 = vadd.f32 %v714_v22, %v369_v35  ;;  %v375_v38 = vadd.f32 %v714_v22, %v374_v36  ;;  %v361_v39 = vpop.f32.mrf.mxu0  ;;  %v366_v40 = vpop.f32.mrf.mxu1 }
  0xb4   : > { %v444_v42 = vmax.f32 %v435_v31, %v443_v33  ;;  %v362_v44 = vadd.f32 %v714_v22, %v361_v39  ;;  %v367_v45 = vadd.f32 %v714_v22, %v366_v40  ;;  %v456_v46 = vmax.f32 %v437_v32, %v455_v34 }
  0xb5   : > { %v383_v47 = vmax.f32 %v370_v37, 0.0  ;;  %v385_v48 = vmax.f32 %v375_v38, 0.0 }
  0xb6   : > { %v380_v50 = vmax.f32 %v362_v44, 0.0  ;;  %v382_v51 = vmax.f32 %v367_v45, 0.0  ;;  %v445_v54 = vrot.slane %v444_v42, 2  ;;  %v457_v57 = vrot.slane %v456_v46, 2 }
  0xb7   : > { %v439_v52 = vmul.f32 %v418_v43, %v383_v47  ;;  %v441_v53 = vmul.f32 %v428_v49, %v385_v48 }
  0xb8   : > { %v436_v55 = vmul.f32 %v403_v26, %v380_v50  ;;  %v438_v56 = vmul.f32 %v413_v41, %v382_v51  ;;  %v446_v3 = vmax.f32 %v444_v42, %v445_v54  ;;  %v458_v7 = vmax.f32 %v456_v46, %v457_v57 }
  0xb9   : > { %v467_v58 = vrot.slane %v439_v52, 4  ;;  %v479_v59 = vrot.slane %v441_v53, 4 }
  0xba   : > { %v449_v60 = vrot.slane %v436_v55, 4  ;;  %v461_v61 = vrot.slane %v438_v56, 4  ;;  %v371_v62 = vpop.f32.mrf.mxu2  ;;  %v376_v63 = vpop.f32.mrf.mxu3  ;;  %v447_v17 = vrot.slane %v446_v3, 1  ;;  %v459_v21 = vrot.slane %v458_v7, 1 }
  0xbb   : > { %v468_v0 = vmax.f32 %v439_v52, %v467_v58  ;;  %v372_v1 = vadd.f32 %v714_v22, %v371_v62  ;;  %v377_v2 = vadd.f32 %v714_v22, %v376_v63  ;;  %v480_v4 = vmax.f32 %v441_v53, %v479_v59 }
  0xbc   : > { %v450_v5 = vmax.f32 %v436_v55, %v449_v60  ;;  %v462_v6 = vmax.f32 %v438_v56, %v461_v61  ;;  %v448_v29 = vmax.f32 %v446_v3, %v447_v17  ;;  %v460_v32 = vmax.f32 %v458_v7, %v459_v21 }
  0xbd   : > { %v384_v8 = vmax.f32 %v372_v1, 0.0  ;;  %v386_v9 = vmax.f32 %v377_v2, 0.0  ;;  %v469_v11 = vrot.slane %v468_v0, 2  ;;  %v481_v18 = vrot.slane %v480_v4, 2 }
  0xbe   : > { %v451_v12 = vrot.slane %v450_v5, 2  ;;  %v463_v13 = vrot.slane %v462_v6, 2 }
  0xbf   : > { %v440_v15 = vmul.f32 %v423_v14, %v384_v8  ;;  %v442_v16 = vmul.f32 %v433_v10, %v386_v9  ;;  %v470_v24 = vmax.f32 %v468_v0, %v469_v11  ;;  %v482_v30 = vmax.f32 %v480_v4, %v481_v18 }
  0xc0   : > { %v452_v19 = vmax.f32 %v450_v5, %v451_v12  ;;  %v464_v20 = vmax.f32 %v462_v6, %v463_v13 }
  0xc1   : > { %v473_v22 = vrot.slane %v440_v15, 4  ;;  %v485_v23 = vrot.slane %v442_v16, 4  ;;  %v471_v35 = vrot.slane %v470_v24, 1  ;;  %v483_v41 = vrot.slane %v482_v30, 1 }
  0xc2   : > { %v453_v25 = vrot.slane %v452_v19, 1  ;;  %v465_v26 = vrot.slane %v464_v20, 1 }
  0xc3   : > { %v474_v27 = vmax.f32 %v440_v15, %v473_v22  ;;  %v486_v28 = vmax.f32 %v442_v16, %v485_v23  ;;  %v472_v45 = vmax.f32 %v470_v24, %v471_v35  ;;  %v484_v47 = vmax.f32 %v482_v30, %v483_v41 }
  0xc4   : > { %v454_v31 = vmax.f32 %v452_v19, %v453_v25  ;;  %v466_v37 = vmax.f32 %v464_v20, %v465_v26 }
  0xc5   : > { %v475_v33 = vrot.slane %v474_v27, 2  ;;  %v487_v34 = vrot.slane %v486_v28, 2 }
  0xc6   : > { %v500_v36 = vsel %vm499_vm0, %v454_v31, %v448_v29 }
  0xc7   : > { %v502_v38 = vsel %vm501_vm1, %v460_v32, %v500_v36  ;;  %v476_v39 = vmax.f32 %v474_v27, %v475_v33  ;;  %v488_v40 = vmax.f32 %v486_v28, %v487_v34 }
  0xc8   : > { %v504_v42 = vsel %vm503_vm2, %v466_v37, %v502_v38 }
  0xc9   : > { %v477_v43 = vrot.slane %v476_v39, 1  ;;  %v489_v44 = vrot.slane %v488_v40, 1  ;;  %v506_v48 = vsel %vm505_vm3, %v472_v45, %v504_v42 }
  0xcb   : > { %v478_v46 = vmax.f32 %v476_v39, %v477_v43  ;;  %v490_v50 = vmax.f32 %v488_v40, %v489_v44 }
  0xcd   : > { %v508_v49 = vsel %vm507_vm4, %v478_v46, %v506_v48 }
  0xce   : > { %v510_v51 = vsel %vm509_vm5, %v484_v47, %v508_v49 }
  0xcf   : > { %v512_v52 = vsel %vm511_vm6, %v490_v50, %v510_v51 }
  0xd0   : > { %514 = vst [vmem:[%s249_s10] sm:$0xff] %v512_v52 }
  0xd1 PF: > { %s14_s15 = sadd.s32 1, %s721_s15  }
  0xd2   : > { %p11_p4 = scmp.ge.s32.totalorder %s14_s15, 6  }
  0xd4   :  { %13 = sbr.rel (!%p11_p4) target bundleno = 1 (0x1), region = 75 }

</bundles_post_ra>
